<compile_context>
chip_gen: v5e
topology: v5e:2x2
jax: 0.10.0
libtpu: 0.0.40
codegen_flags: <defaults>
</compile_context>

<pallas_src>
import jax
import jax.numpy as jnp
from jax import lax
from jax.experimental import pallas as pl
from jax.experimental.pallas import tpu as pltpu

NEG = -1.0e30          # safe "-inf" (avoids NaN in logsumexp)
LPAD = 128             # target axis padded to one full lane width
BG = 8                 # batch rows per DP grid step (one full sublane group)


# --------------------------------------------------------------------------
# Kernel 1: emission gather  E[b, t, s] = logp[b, t, targets[b, s]]
# --------------------------------------------------------------------------
def _make_emission_kernel(after_softmax: bool, dot_dtype):
    def kernel(logits_ref, tgt_ref, out_ref, m_scr, l_scr, acc_scr):
        cc = pl.program_id(2)
        n_cc = pl.num_programs(2)
        tC = logits_ref.shape[2]

        @pl.when(cc == 0)
        def _():
            m_scr[...] = jnp.full_like(m_scr, NEG)
            l_scr[...] = jnp.zeros_like(l_scr)
            acc_scr[...] = jnp.zeros_like(acc_scr)

        x = logits_ref[0]                          # (tT, tC), input dtype
        tgt = tgt_ref[0]                           # (1, LPAD) int32 (pad = C)

        # One-hot gather of this C-chunk (exact: single nonzero per column).
        cls = lax.broadcasted_iota(jnp.int32, (tC, LPAD), 0) + cc * tC
        onehot = (cls == tgt).astype(dot_dtype)    # (tC, LPAD)
        acc_scr[...] += jnp.dot(x.astype(dot_dtype), onehot,
                                preferred_element_type=jnp.float32)

        if not after_softmax:
            # Online logsumexp over C-chunks, accumulated in f32.
            xf = x.astype(jnp.float32)
            cm = jnp.max(xf, axis=1, keepdims=True)                 # (tT, 1)
            cs = jnp.sum(jnp.exp(xf - cm), axis=1, keepdims=True)   # (tT, 1)
            m_old = m_scr[...]
            m_new = jnp.maximum(m_old, cm)
            l_scr[...] = (l_scr[...] * jnp.exp(m_old - m_new)
                          + cs * jnp.exp(cm - m_new))
            m_scr[...] = m_new

        @pl.when(cc == n_cc - 1)
        def _():
            if after_softmax:
                # Inputs are probabilities: E = log(p[t, tgt[s]]); clamp so
                # zero probabilities stay finite (no -inf / NaN in the DP).
                out_ref[0] = jnp.maximum(jnp.log(acc_scr[...]), NEG)
            else:
                out_ref[0] = acc_scr[...] - (m_scr[...] + jnp.log(l_scr[...]))

    return kernel


# --------------------------------------------------------------------------
# Kernel 2: batched alpha recursion over 8 samples per grid step
# --------------------------------------------------------------------------
def _make_dp_kernel(space_idx: int):
    def kernel(ll_smem, e_ref, tgt_ref, llb_ref, tlb_ref, out_ref):
        g = pl.program_id(0)
        T = e_ref.shape[0]

        lane = lax.broadcasted_iota(jnp.int32, (BG, LPAD), 1)
        li = lax.broadcasted_iota(jnp.int32, (LPAD, LPAD), 0)
        lj = lax.broadcasted_iota(jnp.int32, (LPAD, LPAD), 1)
        # One-hot shift matrices: (alpha @ shiftK)[:, s] == alpha[:, s-K].
        shift1 = (lj == li + 1).astype(jnp.float32)
        shift2 = (lj == li + 2).astype(jnp.float32)

        tgt = tgt_ref[...]                  # (8, 128) int32 (pad = C)
        t_len = llb_ref[...]                # (8, 128) int32, row-constant
        l_len = tlb_ref[...]                # (8, 128) int32, row-constant

        space_prev = jnp.dot((tgt == space_idx).astype(jnp.float32), shift1,
                             preferred_element_type=jnp.float32)
        skip_ok = jnp.logical_and(lane >= 2, space_prev > 0.5)

        alpha0 = jnp.where(lane == 0, e_ref[0], NEG)

        # Dynamic loop bound: longest sequence among the 8 samples of this block.
        t_max = ll_smem[g * BG]
        for i in range(1, BG):
            t_max = jnp.maximum(t_max, ll_smem[g * BG + i])
        t_max = jnp.minimum(t_max, T)

        def body(t, alpha):
            e_t = e_ref[t]                                        # one (8,128) vreg
            a1 = jnp.dot(alpha, shift1, preferred_element_type=jnp.float32)
            a1 = jnp.where(lane >= 1, a1, NEG)
            a2 = jnp.dot(alpha, shift2, preferred_element_type=jnp.float32)
            a2 = jnp.where(skip_ok, a2, NEG)
            m3 = jnp.maximum(jnp.maximum(alpha, a1), a2)
            lse = m3 + jnp.log(jnp.exp(alpha - m3) + jnp.exp(a1 - m3)
                               + jnp.exp(a2 - m3))
            alpha_new = lse + e_t
            # Freeze rows whose sequence already ended (per-sample length).
            return jnp.where(t < t_len, alpha_new, alpha)

        alpha = lax.fori_loop(1, t_max, body, alpha0)

        # Row r holds -alpha[r, l_len_r - 1] in exactly one lane, 0 elsewhere;
        # the wrapper reduces over lanes (keeps the output lane-dense).
        out_ref[...] = -jnp.where(lane == (l_len - 1), alpha, 0.0)

    return kernel


def _chunk(total, quantum, preferred):
    """Largest multiple of `quantum` dividing `total` and <= preferred."""
    if total <= preferred or total % quantum != 0:
        return total
    c = preferred - (preferred % quantum)
    while c >= quantum:
        if total % c == 0:
            return c
        c -= quantum
    return total


class CTCWithoutBlankLoss:
    def __init__(self, reduce=True, after_softmax=False, space_idx=-1):
        self._reduce = reduce
        self._after_softmax = after_softmax
        self._space_idx = space_idx

    def __call__(self, logits, targets, logits_lengths, targets_lengths):
        B, T, C = logits.shape
        Lmax = targets.shape[1]
        if Lmax > LPAD:
            raise ValueError(f"target length {Lmax} > {LPAD} is not supported")
        targets = targets.astype(jnp.int32)
        ll = logits_lengths.astype(jnp.int32)
        tl = targets_lengths.astype(jnp.int32)

        # ------------------ kernel 1: emissions ------------------
        tT = _chunk(T, 8, 256)          # time tile
        tC = _chunk(C, 128, 1024)       # class tile (online LSE across chunks)
        dot_dtype = jnp.bfloat16 if logits.dtype == jnp.bfloat16 else jnp.float32
        tgt3 = jnp.full((B, 1, LPAD), C, jnp.int32).at[:, 0, :Lmax].set(targets)

        isz = jnp.dtype(logits.dtype).itemsize
        vmem1 = (2 * tT * tC * isz + 2 * LPAD * 4 + 2 * tT * LPAD * 4
                 + tT * LPAD * 4 + 2 * tT * 4 + (1 << 20))
        vmem1 = int(min(max(2 * vmem1, 32 << 20), 64 << 20))

        emissions = pl.pallas_call(
            _make_emission_kernel(self._after_softmax, dot_dtype),
            grid=(B, T // tT, C // tC),
            in_specs=[
                pl.BlockSpec((1, tT, tC), lambda b, t, c: (b, t, c)),
                pl.BlockSpec((1, 1, LPAD), lambda b, t, c: (b, 0, 0)),
            ],
            out_specs=pl.BlockSpec((1, tT, LPAD), lambda b, t, c: (b, t, 0)),
            out_shape=jax.ShapeDtypeStruct((B, T, LPAD), jnp.float32),
            scratch_shapes=[pltpu.VMEM((tT, 1), jnp.float32),
                            pltpu.VMEM((tT, 1), jnp.float32),
                            pltpu.VMEM((tT, LPAD), jnp.float32)],
            compiler_params=pltpu.CompilerParams(
                dimension_semantics=("parallel", "parallel", "arbitrary"),
                vmem_limit_bytes=vmem1),
        )(logits, tgt3)

        # ------------------ kernel 2: batched DP ------------------
        B_pad = ((B + BG - 1) // BG) * BG
        e_t = jnp.transpose(emissions, (1, 0, 2))          # (T, B, 128)
        if B_pad != B:
            e_t = jnp.concatenate(
                [e_t, jnp.zeros((T, B_pad - B, LPAD), jnp.float32)], axis=1)
        tgt2 = jnp.full((B_pad, LPAD), C, jnp.int32).at[:B, :Lmax].set(targets)
        ll_pad = jnp.ones((B_pad,), jnp.int32).at[:B].set(ll)
        tl_pad = jnp.ones((B_pad,), jnp.int32).at[:B].set(tl)
        llb = jnp.broadcast_to(ll_pad[:, None], (B_pad, LPAD))
        tlb = jnp.broadcast_to(tl_pad[:, None], (B_pad, LPAD))

        vmem2 = 2 * T * BG * LPAD * 4 + 2 * 4 * BG * LPAD * 4 + (1 << 20)
        vmem2 = int(min(max(2 * vmem2, 32 << 20), 64 << 20))

        grid_spec = pltpu.PrefetchScalarGridSpec(
            num_scalar_prefetch=1,
            grid=(B_pad // BG,),
            in_specs=[
                pl.BlockSpec((T, BG, LPAD), lambda g, ll_r: (0, g, 0)),
                pl.BlockSpec((BG, LPAD), lambda g, ll_r: (g, 0)),
                pl.BlockSpec((BG, LPAD), lambda g, ll_r: (g, 0)),
                pl.BlockSpec((BG, LPAD), lambda g, ll_r: (g, 0)),
            ],
            out_specs=pl.BlockSpec((BG, LPAD), lambda g, ll_r: (g, 0)),
        )
        out = pl.pallas_call(
            _make_dp_kernel(self._space_idx),
            grid_spec=grid_spec,
            out_shape=jax.ShapeDtypeStruct((B_pad, LPAD), jnp.float32),
            compiler_params=pltpu.CompilerParams(
                dimension_semantics=("parallel",),
                vmem_limit_bytes=vmem2),
        )(ll_pad, e_t, tgt2, llb, tlb)

        loss = jnp.sum(out, axis=1)[:B]          # per-sample losses, shape (B,)
        if self._reduce:
            return loss.sum()
        return loss


# --------------------------------------------------------------------------
# Pure-JAX reference of the same DP (for correctness checking)
# --------------------------------------------------------------------------
def _ref_loss(logits, targets, ll, tl, space_idx=-1, after_softmax=False):
    if after_softmax:
        logp = jnp.maximum(jnp.log(logits), NEG)
    else:
        logp = jax.nn.log_softmax(logits, axis=2)
    B, T, C = logits.shape
    Lmax = targets.shape[1]
    s_idx = jnp.arange(Lmax)
    losses = []
    for b in range(B):
        E = logp[b][:, targets[b]]             # (T, Lmax)
        alpha = jnp.where(s_idx == 0, E[0], NEG)
        tgt_prev = jnp.concatenate([jnp.array([-123456], jnp.int32),
                                    targets[b][:-1].astype(jnp.int32)])
        skip_ok = (s_idx >= 2) & (tgt_prev == space_idx)
        for t in range(1, int(ll[b])):
            a1 = jnp.concatenate([jnp.array([NEG], jnp.float32), alpha[:-1]])
            a2 = jnp.concatenate([jnp.array([NEG, NEG], jnp.float32), alpha[:-2]])
            a2 = jnp.where(skip_ok, a2, NEG)
            m = jnp.maximum(jnp.maximum(alpha, a1), a2)
            alpha = m + jnp.log(jnp.exp(alpha - m) + jnp.exp(a1 - m)
                                + jnp.exp(a2 - m)) + E[t]
        losses.append(-alpha[int(tl[b]) - 1])
    return jnp.stack(losses).sum()


if __name__ == "__main__":
    key = jax.random.PRNGKey(0)
    k1, k2 = jax.random.split(key)
    B, T, C, Lmax = 4, 16, 32, 8

    logits = jax.random.normal(k1, (B, T, C), dtype=jnp.float32)
    targets = jax.random.randint(k2, (B, Lmax), 0, C, dtype=jnp.int32)
    logits_lengths = jnp.array([16, 12, 9, 16], dtype=jnp.int32)
    targets_lengths = jnp.array([8, 5, 3, 8], dtype=jnp.int32)

    module = CTCWithoutBlankLoss(reduce=True, after_softmax=False, space_idx=-1)
    loss = jax.block_until_ready(
        module(logits, targets, logits_lengths, targets_lengths))

    ref = _ref_loss(logits, targets, logits_lengths, targets_lengths)
    assert jnp.allclose(loss, ref, rtol=2e-3, atol=1e-2), (loss, ref)
    print("KERNEL_OK")
</pallas_src>

<mosaic_0001>
module attributes {stable_mosaic.version = 11 : i64} {
  func.func @kernel(%arg0: i32, %arg1: i32, %arg2: i32, %arg3: memref<1x16x32xf32, #tpu.memory_space<vmem>>, %arg4: memref<1x1x128xi32, #tpu.memory_space<vmem>>, %arg5: memref<1x16x128xf32, #tpu.memory_space<vmem>>, %arg6: memref<16x1xf32, #tpu.memory_space<vmem>>, %arg7: memref<16x1xf32, #tpu.memory_space<vmem>>, %arg8: memref<16x128xf32, #tpu.memory_space<vmem>>) attributes {dimension_semantics = [#tpu.dimension_semantics<parallel>, #tpu.dimension_semantics<parallel>, #tpu.dimension_semantics<arbitrary>], iteration_bounds = array<i64: 4, 1, 1>, scalar_prefetch = 0 : i64, scratch_operands = 3 : i64, tpu.core_type = #tpu.core_type<tc>, window_params = [{transform_indices = @transform_0, window_bounds = array<i64: 1, 16, 32>}, {transform_indices = @transform_1, window_bounds = array<i64: 1, 1, 128>}, {transform_indices = @transform_2, window_bounds = array<i64: 1, 16, 128>}]} {
    %c0_i32 = arith.constant 0 : i32
    %0 = arith.cmpi eq, %arg2, %c0_i32 : i32
    %1 = arith.extui %0 : i1 to i32
    %c0_i32_0 = arith.constant 0 : i32
    %2 = arith.cmpi ne, %1, %c0_i32_0 : i32
    scf.if %2 {
      %cst_22 = arith.constant -1.000000e+30 : f32
      %41 = vector.broadcast %cst_22 : f32 to vector<16x1xf32>
      %c0_23 = arith.constant 0 : index
      %c0_24 = arith.constant 0 : index
      %42 = vector.load %arg6[%c0_23, %c0_24] : memref<16x1xf32, #tpu.memory_space<vmem>>, vector<16x1xf32>
      tpu.vector_store %arg6[%c0_23, %c0_24], %41 {strides = array<i32>} : memref<16x1xf32, #tpu.memory_space<vmem>>, vector<16x1xf32>,
      %cst_25 = arith.constant 0.000000e+00 : f32
      %43 = vector.broadcast %cst_25 : f32 to vector<16x1xf32>
      %c0_26 = arith.constant 0 : index
      %c0_27 = arith.constant 0 : index
      %44 = vector.load %arg7[%c0_26, %c0_27] : memref<16x1xf32, #tpu.memory_space<vmem>>, vector<16x1xf32>
      tpu.vector_store %arg7[%c0_26, %c0_27], %43 {strides = array<i32>} : memref<16x1xf32, #tpu.memory_space<vmem>>, vector<16x1xf32>,
      %cst_28 = arith.constant 0.000000e+00 : f32
      %45 = vector.broadcast %cst_28 : f32 to vector<16x128xf32>
      %c0_29 = arith.constant 0 : index
      %c0_30 = arith.constant 0 : index
      %46 = vector.load %arg8[%c0_29, %c0_30] : memref<16x128xf32, #tpu.memory_space<vmem>>, vector<16x128xf32>
      tpu.vector_store %arg8[%c0_29, %c0_30], %45 {strides = array<i32>} : memref<16x128xf32, #tpu.memory_space<vmem>>, vector<16x128xf32>,
    } else {
    }
    %c0 = arith.constant 0 : index
    %c0_1 = arith.constant 0 : index
    %c0_2 = arith.constant 0 : index
    %3 = vector.load %arg3[%c0, %c0_1, %c0_2] : memref<1x16x32xf32, #tpu.memory_space<vmem>>, vector<1x16x32xf32>
    %4 = vector.shape_cast %3 : vector<1x16x32xf32> to vector<16x32xf32>
    %c0_3 = arith.constant 0 : index
    %c0_4 = arith.constant 0 : index
    %c0_5 = arith.constant 0 : index
    %5 = vector.load %arg4[%c0_3, %c0_4, %c0_5] : memref<1x1x128xi32, #tpu.memory_space<vmem>>, vector<1x1x128xi32>
    %6 = vector.shape_cast %5 : vector<1x1x128xi32> to vector<1x128xi32>
    %7 = tpu.iota {dimensions = array<i32: 0>} : vector<32x128xi32>
    %c32_i32 = arith.constant 32 : i32
    %8 = arith.muli %arg2, %c32_i32 : i32
    %9 = vector.broadcast %8 : i32 to vector<32x128xi32>
    %10 = arith.addi %7, %9 : vector<32x128xi32>
    %11 = vector.broadcast %6 : vector<1x128xi32> to vector<32x128xi32>
    %12 = arith.cmpi eq, %10, %11 : vector<32x128xi32>
    %13 = arith.extui %12 : vector<32x128xi1> to vector<32x128xi32>
    %14 = arith.sitofp %13 : vector<32x128xi32> to vector<32x128xf32>
    %c0_6 = arith.constant 0 : index
    %c0_7 = arith.constant 0 : index
    %15 = vector.load %arg8[%c0_6, %c0_7] : memref<16x128xf32, #tpu.memory_space<vmem>>, vector<16x128xf32>
    %cst = arith.constant dense<0.000000e+00> : vector<16x128xf32>
    %16 = tpu.matmul %4, %14, %cst {dimension_numbers = #tpu.dot_dimension_numbers<[1], [0], [0], [1], [0, 0, 1, 1], [], []>} : vector<16x32xf32>, vector<32x128xf32>, vector<16x128xf32> -> vector<16x128xf32>
    %17 = arith.addf %15, %16 : vector<16x128xf32>
    %c0_8 = arith.constant 0 : index
    %c0_9 = arith.constant 0 : index
    %18 = vector.load %arg8[%c0_8, %c0_9] : memref<16x128xf32, #tpu.memory_space<vmem>>, vector<16x128xf32>
    tpu.vector_store %arg8[%c0_8, %c0_9], %17 {strides = array<i32>} : memref<16x128xf32, #tpu.memory_space<vmem>>, vector<16x128xf32>,
    %cst_10 = arith.constant dense<0xFF800000> : vector<16xf32>
    %19 = vector.multi_reduction <maximumf>, %4, %cst_10 [1] : vector<16x32xf32> to vector<16xf32>
    %20 = vector.shape_cast %19 : vector<16xf32> to vector<16x1xf32>
    %21 = vector.broadcast %20 : vector<16x1xf32> to vector<16x32xf32>
    %22 = arith.subf %4, %21 : vector<16x32xf32>
    %23 = math.exp %22 : vector<16x32xf32>
    %cst_11 = arith.constant dense<0.000000e+00> : vector<16xf32>
    %24 = vector.multi_reduction <add>, %23, %cst_11 [1] : vector<16x32xf32> to vector<16xf32>
    %25 = vector.shape_cast %24 : vector<16xf32> to vector<16x1xf32>
    %c0_12 = arith.constant 0 : index
    %c0_13 = arith.constant 0 : index
    %26 = vector.load %arg6[%c0_12, %c0_13] : memref<16x1xf32, #tpu.memory_space<vmem>>, vector<16x1xf32>
    %27 = arith.maximumf %26, %20 : vector<16x1xf32>
    %c0_14 = arith.constant 0 : index
    %c0_15 = arith.constant 0 : index
    %28 = vector.load %arg7[%c0_14, %c0_15] : memref<16x1xf32, #tpu.memory_space<vmem>>, vector<16x1xf32>
    %29 = arith.subf %26, %27 : vector<16x1xf32>
    %30 = math.exp %29 : vector<16x1xf32>
    %31 = arith.mulf %28, %30 : vector<16x1xf32>
    %32 = arith.subf %20, %27 : vector<16x1xf32>
    %33 = math.exp %32 : vector<16x1xf32>
    %34 = arith.mulf %25, %33 : vector<16x1xf32>
    %35 = arith.addf %31, %34 : vector<16x1xf32>
    %c0_16 = arith.constant 0 : index
    %c0_17 = arith.constant 0 : index
    %36 = vector.load %arg7[%c0_16, %c0_17] : memref<16x1xf32, #tpu.memory_space<vmem>>, vector<16x1xf32>
    tpu.vector_store %arg7[%c0_16, %c0_17], %35 {strides = array<i32>} : memref<16x1xf32, #tpu.memory_space<vmem>>, vector<16x1xf32>,
    %c0_18 = arith.constant 0 : index
    %c0_19 = arith.constant 0 : index
    %37 = vector.load %arg6[%c0_18, %c0_19] : memref<16x1xf32, #tpu.memory_space<vmem>>, vector<16x1xf32>
    tpu.vector_store %arg6[%c0_18, %c0_19], %27 {strides = array<i32>} : memref<16x1xf32, #tpu.memory_space<vmem>>, vector<16x1xf32>,
    %c0_i32_20 = arith.constant 0 : i32
    %38 = arith.cmpi eq, %arg2, %c0_i32_20 : i32
    %39 = arith.extui %38 : i1 to i32
    %c0_i32_21 = arith.constant 0 : i32
    %40 = arith.cmpi ne, %39, %c0_i32_21 : i32
    scf.if %40 {
      %c0_22 = arith.constant 0 : index
      %c0_23 = arith.constant 0 : index
      %41 = vector.load %arg8[%c0_22, %c0_23] : memref<16x128xf32, #tpu.memory_space<vmem>>, vector<16x128xf32>
      %c0_24 = arith.constant 0 : index
      %c0_25 = arith.constant 0 : index
      %42 = vector.load %arg6[%c0_24, %c0_25] : memref<16x1xf32, #tpu.memory_space<vmem>>, vector<16x1xf32>
      %c0_26 = arith.constant 0 : index
      %c0_27 = arith.constant 0 : index
      %43 = vector.load %arg7[%c0_26, %c0_27] : memref<16x1xf32, #tpu.memory_space<vmem>>, vector<16x1xf32>
      %44 = math.log %43 : vector<16x1xf32>
      %45 = arith.addf %42, %44 : vector<16x1xf32>
      %46 = vector.broadcast %45 : vector<16x1xf32> to vector<16x128xf32>
      %47 = arith.subf %41, %46 : vector<16x128xf32>
      %c0_28 = arith.constant 0 : index
      %c0_29 = arith.constant 0 : index
      %c0_30 = arith.constant 0 : index
      %48 = vector.load %arg5[%c0_28, %c0_29, %c0_30] : memref<1x16x128xf32, #tpu.memory_space<vmem>>, vector<1x16x128xf32>
      %49 = vector.shape_cast %48 : vector<1x16x128xf32> to vector<16x128xf32>
      %50 = vector.shape_cast %47 : vector<16x128xf32> to vector<1x16x128xf32>
      tpu.vector_store %arg5[%c0_28, %c0_29, %c0_30], %50 {strides = array<i32>} : memref<1x16x128xf32, #tpu.memory_space<vmem>>, vector<1x16x128xf32>,
    } else {
    }
    return
  }
  func.func @transform_0(%arg0: i32, %arg1: i32, %arg2: i32) -> (i32, i32, i32) {
    %c0_i32 = arith.constant 0 : i32
    return %arg0, %arg1, %arg2 : i32, i32, i32
  }
  func.func @transform_1(%arg0: i32, %arg1: i32, %arg2: i32) -> (i32, i32, i32) {
    %c0_i32 = arith.constant 0 : i32
    %c0_i32_0 = arith.constant 0 : i32
    %c0_i32_1 = arith.constant 0 : i32
    return %arg0, %c0_i32, %c0_i32_0 : i32, i32, i32
  }
  func.func @transform_2(%arg0: i32, %arg1: i32, %arg2: i32) -> (i32, i32, i32) {
    %c0_i32 = arith.constant 0 : i32
    %c0_i32_0 = arith.constant 0 : i32
    return %arg0, %arg1, %c0_i32 : i32, i32, i32
  }
}

</mosaic_0001>

<bundles_post_ra>
// kernel: tpu_custom_call.1
= control target key start
LH: loop header
LB: loop body
LE: loop exit
PB: predicated region body
PF: predicated region fallthrough
CT: control target
= control target key end

     0   :  { %7 = vsyncpa [#allocation6], 0  ;;  %s957_s0 = inlined_call_operand.hbm [shape: f32[4,16,32], index: 0, kind: input, shape index: {}]   ;;  %s958_s1 = inlined_call_operand.hbm [shape: s32[4,1,128], index: 1, kind: input, shape index: {}]   ;;  %s959_s2 = inlined_call_operand.hbm [shape: f32[4,16,128], index: 2, kind: output, shape index: {}]  }
   0x1   :  { %9 = vsyncpa [#allocation6 + $0x1], 0 }
   0x2   :  { %10 = vsyncpa [#allocation9], 0 }
   0x3   :  { %12 = vsyncpa [#allocation9 + $0x1], 0 }
   0x4   :  { %13 = vsyncpa [#allocation7], 0 }
   0x5   :  { %15 = vsyncpa [#allocation7 + $0x1], 0  ;;  %s803_s9 = smov 0   ;;  %s805_s10 = smov 0  }
   0x6   :  { %s807_s11 = smov 0   ;;  %s809_s12 = smov 0  }
   0x7   :  { %s811_s13 = smov 0   ;;  %s813_s14 = smov 0  }
   0x8 LB: > { %s507_s15 = sadd.s32 4294967295, %s778_s14   ;;  %s508_s16 = sadd.s32 4294967294, %s778_s14   ;;  %s778_s14 = sphi %s813_s14, %s21_s14   ;;  %s774_s13 = sphi %s811_s13, %s969_s13   ;;  %s770_s12 = sphi %s809_s12, %s968_s12   ;;  %s766_s11 = sphi %s807_s11, %s967_s11   ;;  %s762_s10 = sphi %s805_s10, %s966_s10   ;;  %s758_s9 = sphi %s803_s9, %s965_s9  }
   0x9   : > { %s40_s17 = sadd.s32 1, %s774_s13  ;;  %s51_s18 = sadd.s32 1, %s766_s11 }
   0xa   : > { %p42_p0 = scmp.ge.s32.totalorder %s40_s17, 4  ;;  %p58_p1 = scmp.ne.s32.totalorder %s766_s11, %s762_s10 }
   0xb   : > { %p59_p2 = scmp.eq.s32.totalorder %s778_s14, 0  ;;  %p64_p3 = scmp.ne.s32.totalorder %s762_s10, %s758_s9 }
   0xc   : > { %s971_s17 = smov (%p42_p0, %s40_s17), 0  ;;  %p65_p5 = scmp.eq.s32.totalorder %s507_s15, 0 }
   0xd   : > { %p844_p4 = por %p59_p2, %p58_p1  ;;  %s44_s20 = ssub.s32 %s774_s13, %s971_s17 }
   0xe   : > { %p116_p6 = scmp.eq.s32.totalorder %s507_s15, 3  ;;  %p49_p7 = scmp.eq.s32.totalorder %s44_s20, 0 }
   0xf   : > { %p850_p8 = por %p65_p5, %p64_p3  ;;  %p122_p10 = scmp.eq.s32.totalorder %s508_s16, 3 }
  0x10   : > { %p854_p9 = por %p116_p6, %p58_p1  ;;  %p555_p12 = scmp.lt.s32.totalorder %s778_s14, 4 }
  0x11   : > { %s859_s23 = scalar_select %p49_p7, %s766_s11, %s51_s18  }
  0x12   : > { %p861_p11 = por %p122_p10, %p64_p3  ;;  %s142_s25 = sand.u32 1, %s766_s11  }
  0x13   : > { %s511_s26 = sshll.u32 %s142_s25, 4  ;;  %s532_s27 = sshll.u32 %s774_s13, 4 }
  0x14   : > { %s154_s30 = scalar_lea.hbm %s957_s0, %s532_s27  ;;  %s146_s3 = scalar_lea.vmem [#allocation5], %s511_s26 }
  0x15   : > { %s157_s4 = sshll.u32 %s146_s3, 4  ;;  %s155_s5 = sshll.u32 %s154_s30, 4  ;;  %s158_s4 = int_to_ptr.vmem [resolvable:$true] %s157_s4  ;;  %s156_s5 = int_to_ptr.hbm [resolvable:$true] %s155_s5 }
  0x16   : > { %p873_p13 = pnand %p555_p12, %p844_p4  ;;  %p514_p0 = scmp.ge.s32.totalorder %s778_s14, 1 }
  0x17   : > { %s143_s7 = scalar_lea.sflag [#allocation6], %s142_s25  ;;  %s780_s8 = smov 128  }
  0x18   : > { %s781_s15 = smov 8   ;;  %p182_p1 = scmp.lt.s32.totalorder %s778_s14, 5 }
  0x19   : > { %547 = dma.hbm_to_vmem [thread:$0]  (!%p873_p13), %s156_s5, 256, %s158_s4, %s143_s7, %s780_s8, %s780_s8, %s781_s15  }
  0x1a   : > { %s173_s20 = scalar_lea.hbm %s958_s1, %s774_s13  ;;  %p183_p2 = pnand %p514_p0, %p182_p1 }
  0x1b   : > { %s175_s26 = sshll.u32 %s173_s20, 4  ;;  %s170_s19 = scalar_lea.vmem [#allocation8], %s142_s25  ;;  %s176_s26 = int_to_ptr.hbm [resolvable:$true] %s175_s26 }
  0x1c   : > { %s177_s27 = sshll.u32 %s170_s19, 4  ;;  %s168_s28 = scalar_lea.sflag [#allocation9], %s142_s25  ;;  %s178_s27 = int_to_ptr.vmem [resolvable:$true] %s177_s27 }
  0x1d   : > { %550 = dma.hbm_to_vmem [thread:$0]  (!%p873_p13), %s176_s26, 16, %s178_s27, %s168_s28  }
  0x1e   : > { %186 = sbr.rel (%p183_p2) target bundleno = 412 (0x19c), region = 28  ;;  %s888_s29 = sand.u32 (!%p183_p2), 1, %s762_s10  }
  0x1f   : > { %s515_s30 = sshll.u32 (!%p183_p2), %s888_s29, 4  ;;  %s189_s3 = scalar_lea.sflag (!%p183_p2), [#allocation6], %s888_s29 }
  0x20   : > { %s192_s4 = scalar_lea.vmem (!%p183_p2), [#allocation5], %s515_s30 }
  0x23   : > { %745 = dma.done.wait (%p850_p8), %s189_s3, 256  }
  0x24   : > { %747 = vsyncadd (%p850_p8), %s189_s3, 4294967040  ;;  %s199_s25 = scalar_lea.sflag [#allocation9], %s888_s29  ;;  %s201_s5 = scalar_lea.vmem [#allocation8], %s888_s29 }
  0x25   : > { %749 = dma.done.wait (%p850_p8), %s199_s25, 16  }
  0x26   : > { %751 = vsyncadd (%p850_p8), %s199_s25, 4294967280  ;;  %vm233_vm0 = vcmask 7168   ;;  %v782_v0 = vmov -1e+30   ;;  %vm269_vm1 = vcmask 261120   ;;  %v240_v1 = vld [vmem:[%s192_s4] sm:$0xff]  ;;  %v243_v6 = vlaneseq }
  0x27   : > { %234 = vst.msk [vmem:[#allocation2] sm:$0xff] %vm233_vm0, %v782_v0  ;;  %v303_v2 = vsel %vm269_vm1, %v240_v1, -inf  ;;  %v241_v3 = vld [vmem:[%s192_s4 + $0x8] sm:$0xff]  ;;  %v783_v5 = vmov 0.0   ;;  %v615_v8 = vld [vmem:[%s201_s5] ss:$0 sm:$0xff] }
  0x28   : > { %235 = vst.msk [vmem:[#allocation2 + $0x8] sm:$0xff] %vm233_vm0, %v782_v0  ;;  %304 = vmax.xlane.f32.xlu0 %v303_v2  ;;  %v306_v4 = vsel %vm269_vm1, %v241_v3, -inf  ;;  %v244_v7 = vshrl.u32 %v243_v6, 7  ;;  %v784_v12 = vmov 1.0   ;;  %v785_v31 = vmov 0   ;;  %s533_s21 = sshll.u32 %s770_s12, 4 }
  0x29   : > { %236 = vst.msk [vmem:[#allocation3] sm:$0xff] %vm233_vm0, %v783_v5  ;;  %613 = vset.pattern.permute.xlu2 %v785_v31  ;;  %614 = vset.pattern.permute.xlu0 %v785_v31  ;;  %s393_s8 = scalar_lea.hbm %s959_s2, %s533_s21  ;;  %s226_s15 = scalar_lea.vmem [#allocation10], %s515_s30 }
  0x2a   : > { %237 = vst.msk [vmem:[#allocation3 + $0x8] sm:$0xff] %vm233_vm0, %v783_v5  ;;  %v247_v9 = vadd.s32 24, %v244_v7  ;;  %v246_v10 = vadd.s32 16, %v244_v7  ;;  %v245_v11 = vadd.s32 8, %v244_v7  ;;  %vm255_vm5 = vcmp.eq.s32.totalorder %v244_v7, %v615_v8  ;;  %s394_s16 = sshll.u32 %s226_s15, 4  ;;  %s396_s18 = sshll.u32 %s393_s8, 4  ;;  %s395_s16 = int_to_ptr.vmem [resolvable:$true] %s394_s16  ;;  %s397_s18 = int_to_ptr.hbm [resolvable:$true] %s396_s18 }
  0x2b   : > { %s380_s20 = scalar_lea.sflag [#allocation7], %s888_s29  ;;  %s706_s12 = sshra.s32 %s397_s18, 4  ;;  %s707_s12 = int_to_ptr.hbm [resolvable:$true] %s706_s12 }
  0x2c   : > { %vm258_vm2 = vcmp.eq.s32.totalorder %v247_v9, %v615_v8  ;;  %vm257_vm3 = vcmp.eq.s32.totalorder %v246_v10, %v615_v8  ;;  %vm256_vm4 = vcmp.eq.s32.totalorder %v245_v11, %v615_v8  ;;  %s708_s26 = scalar_lea.hbm %s707_s12, 16  ;;  %s712_s28 = scalar_lea.hbm %s959_s2, 64 }
  0x2d   : > { %521 = vmatpush.msk.msra.mxu0 %vm258_vm2, %v784_v12  ;;  %534 = vmatpush.msk.msra.mxu1 %vm258_vm2, %v784_v12  ;;  %p709_p3 = scmp.ne.s32.totalorder %s707_s12, %s708_s26  ;;  %p713_p6 = scmp.lt.s32.totalorder %s707_s12, %s959_s2 }
  0x2e   : > { %v321_v13 = vld [vmem:[#allocation2] sm:$0xff]  ;;  %p714_p7 = scmp.lt.s32.totalorder %s712_s28, %s708_s26 }
  0x2f   : > { %522 = vmatpush.msk.msra.mxu0 %vm257_vm3, %v784_v12  ;;  %535 = vmatpush.msk.msra.mxu1 %vm257_vm3, %v784_v12  ;;  %v322_v20 = vld [vmem:[#allocation2 + $0x8] sm:$0xff]  ;;  %p710_p4 = pnand %p709_p3, %p854_p9 }
  0x30   : > { %307 = vmax.xlane.f32.xlu0 %v306_v4  ;;  %v325_v37 = vld [vmem:[#allocation3] sm:$0xff]  ;;  %p715_p8 = por %p714_p7, %p713_p6 }
  0x31   : > { %523 = vmatpush.msk.msra.mxu0 %vm256_vm4, %v784_v12  ;;  %536 = vmatpush.msk.msra.mxu1 %vm256_vm4, %v784_v12  ;;  %v326_v44 = vld [vmem:[#allocation3 + $0x8] sm:$0xff]  ;;  %p711_p5 = pneg %p710_p4 }
  0x33   : > { %524 = vmatpush.msk.msra.mxu0 %vm255_vm5, %v784_v12  ;;  %537 = vmatpush.msk.msra.mxu1 %vm255_vm5, %v784_v12  ;;  %p716_p10 = pnand %p715_p8, %p711_p5 }
  0x34   : > { %525 = vmatmul.msk.f32.vlgmr.msra.gmra.mxu0 %vm269_vm1, %v240_v1  ;;  %526 = vmatmul.msk.f32.vlgmr.msra.gmra.mxu1 %vm269_vm1, %v241_v3 }
  0x9b   : > { %v305_v14 = vpop.xlane.xlu0 %304 }
  0x9c   : > { %v309_v15 = vsub.f32 %v240_v1, %v305_v14  ;;  %v323_v16 = vmax.f32 %v321_v13, %v305_v14 }
  0x9e   : > { %v311_v17 = vmul.f32 1.442695, %v309_v15  ;;  %v327_v18 = vsub.f32 %v321_v13, %v323_v16  ;;  %v335_v19 = vsub.f32 %v305_v14, %v323_v16  ;;  %348 = vst.msk [vmem:[#allocation2] sm:$0xff] %vm233_vm0, %v323_v16 }
  0xa0   : > { %616 = vpow2.f32 %v311_v17  ;;  %v329_v32 = vmul.f32 1.442695, %v327_v18  ;;  %v337_v33 = vmul.f32 1.442695, %v335_v19 }
  0xa3   : > { %v308_v21 = vpop.xlane.xlu0 %307 }
  0xa4   : > { %v310_v22 = vsub.f32 %v241_v3, %v308_v21  ;;  %v324_v23 = vmax.f32 %v322_v20, %v308_v21 }
  0xa5   : > { %v355_v54 = vld [vmem:[#allocation2] sm:$0xff] }
  0xa6   : > { %v617_v24 = vpop.eup %616  ;;  %v313_v25 = vmul.f32 1.442695, %v310_v22  ;;  %v328_v26 = vsub.f32 %v322_v20, %v324_v23  ;;  %v336_v27 = vsub.f32 %v308_v21, %v324_v23  ;;  %349 = vst.msk [vmem:[#allocation2 + $0x8] sm:$0xff] %vm233_vm0, %v324_v23 }
  0xa7   : > { %v315_v28 = vsel %vm269_vm1, %v617_v24, 0.0 }
  0xa8   : > { %618 = vpow2.f32 %v313_v25  ;;  %316 = vadd.xlane.f32.xlu1 %v315_v28  ;;  %v331_v34 = vmul.f32 1.442695, %v328_v26  ;;  %v339_v36 = vmul.f32 1.442695, %v336_v27 }
  0xa9   : > { %620 = vpow2.f32 %v329_v32 }
  0xaa   : > { %622 = vpow2.f32 %v337_v33 }
  0xab   : > { %624 = vpow2.f32 %v331_v34 }
  0xac   : > { %626 = vpow2.f32 %v339_v36 }
  0xad   : > { %v356_v58 = vld [vmem:[#allocation2 + $0x8] sm:$0xff] }
  0xae   : > { %v619_v29 = vpop.eup %618 }
  0xaf   : > { %v318_v30 = vsel %vm269_vm1, %v619_v29, 0.0  ;;  %v621_v35 = vpop.eup %620 }
  0xb0   : > { %319 = vadd.xlane.f32.xlu1 %v318_v30  ;;  %v623_v38 = vpop.eup %622  ;;  %v333_v40 = vmul.f32 %v621_v35, %v325_v37 }
  0xb1   : > { %v625_v43 = vpop.eup %624  ;;  %v293_v60 = vpop.f32.mrf.mxu0 }
  0xb2   : > { %v627_v45 = vpop.eup %626  ;;  %v334_v47 = vmul.f32 %v625_v43, %v326_v44  ;;  %v296_v63 = vpop.f32.mrf.mxu1 }
 0x11b   : > { %v317_v39 = vpop.xlane.xlu1 %316 }
 0x11c   : > { %v341_v41 = vmul.f32 %v623_v38, %v317_v39 }
 0x11e   : > { %v343_v42 = vadd.f32 %v341_v41, %v333_v40 }
 0x120   : > { %346 = vst.msk [vmem:[#allocation3] sm:$0xff] %vm233_vm0, %v343_v42 }
 0x123   : > { %v320_v46 = vpop.xlane.xlu1 %319 }
 0x124   : > { %v342_v48 = vmul.f32 %v627_v45, %v320_v46 }
 0x126   : > { %v344_v49 = vadd.f32 %v342_v48, %v334_v47 }
 0x127   : > { %v357_v50 = vld [vmem:[#allocation3] sm:$0xff] }
 0x128   : > { %347 = vst.msk [vmem:[#allocation3 + $0x8] sm:$0xff] %vm233_vm0, %v344_v49  ;;  %628 = vlog2.f32 %v357_v50 }
 0x12e   : > { %v629_v51 = vpop.eup %628 }
 0x12f   : > { %v360_v52 = vmul.f32 0.6931472, %v629_v51  ;;  %v358_v53 = vld [vmem:[#allocation3 + $0x8] sm:$0xff] }
 0x130   : > { %630 = vlog2.f32 %v358_v53 }
 0x131   : > { %v363_v55 = vadd.f32 %v360_v52, %v355_v54 }
 0x133   : > { %367 = vperm.xlu2 %613, %v363_v55  }
 0x136   : > { %v631_v56 = vpop.eup %630 }
 0x137   : > { %v362_v57 = vmul.f32 0.6931472, %v631_v56 }
 0x139   : > { %v364_v59 = vadd.f32 %v362_v57, %v356_v58 }
 0x13b   : > { %372 = vperm.xlu2 %613, %v364_v59  }
 0x18d   : > { %v368_v61 = vpop.permute.xlu2 %367 }
 0x18e   : > { %v375_v62 = vsub.f32 %v293_v60, %v368_v61 }
 0x190   : > { %377 = vst [vmem:[%s226_s15] sm:$0xff] %v375_v62 }
 0x195   : > { %v373_v0 = vpop.permute.xlu2 %372 }
 0x196   : > { %v376_v1 = vsub.f32 %v296_v63, %v373_v0 }
 0x198   : > { %378 = vst [vmem:[%s226_s15 + $0x8] sm:$0xff] %v376_v1 }
 0x199   : > { %719 = shalt.err (!%p716_p10)
}
 0x19a   : > { %s786_s29 = smov 128   ;;  %s787_s4 = smov 8  }
 0x19b   : > { %542 = dma.vmem_to_hbm [thread:$0]  (%p854_p9), %s395_s16, 256, %s397_s18, %s380_s20, %s786_s29, %s786_s29, %s787_s4  }
 0x19c PF: > { %p556_p12 = scmp.ge.s32.totalorder %s778_s14, 2  ;;  %s411_s25 = sand.u32 1, %s758_s9  }
 0x19d   : > { %s412_s5 = scalar_lea.sflag [#allocation7], %s411_s25 }
 0x19e   : > { %p552_p13 = pnand %p556_p12, %p861_p11 }
 0x1a0   : > { %p553_p0 = pneg %p552_p13 }
 0x1a2   : > { %753 = dma.done.wait (%p553_p0), %s412_s5, 256  }
 0x1a3   : > { %755 = vsyncadd (%p553_p0), %s412_s5, 4294967040  ;;  %s21_s14 = sadd.s32 1, %s778_s14   ;;  %s965_s9 = smov %s762_s10 }
 0x1a4   : > { %p18_p1 = scmp.ge.s32.totalorder %s21_s14, 6   ;;  %s966_s10 = smov %s766_s11 }
 0x1a5   : > { %s967_s11 = smov %s859_s23  ;;  %s968_s12 = smov %s774_s13 }
 0x1a6   : > { %s969_s13 = smov %s971_s17  ;;  %20 = sbr.rel (!%p18_p1) target bundleno = 8 (0x8), region = 94 }
 0x1ab   :  { %418 = vsyncpa [#allocation6], 1 }
 0x1ac   :  { %420 = vsyncpa [#allocation6 + $0x1], 1 }
 0x1ad   :  { %421 = vsyncpa [#allocation9], 1 }
 0x1ae   :  { %423 = vsyncpa [#allocation9 + $0x1], 1 }
 0x1af   :  { %424 = vsyncpa [#allocation7], 1 }
 0x1b0   :  { %426 = vsyncpa [#allocation7 + $0x1], 1 }

</bundles_post_ra>
